<compile_context>
chip_gen: v7x
topology: tpu7x:2x2x1
jax: 0.10.0
libtpu: 0.0.40
codegen_flags: <defaults>
</compile_context>

<pallas_src>
import jax
import jax.numpy as jnp
import numpy as np
from jax.experimental import pallas as pl
from jax.experimental.pallas import tpu as pltpu


def _spatial_sep_kernel(xt_ref, c_ref, bias_ref, o_ref):
    # xt_ref  : (tm, Cin*k*W)    bf16 VMEM  rows = b*Hout + h, cols = (c,t,w')
    # c_ref   : (Cin*k*W, Npad)  bf16 VMEM  fused conv1*BN1*conv2*BN2 operand,
    #                                       columns in ChannelShuffle order,
    #                                       zero-padded to a 128-lane multiple
    # bias_ref: (1, Npad)        f32  VMEM  BN2 shift + BN1 shift through conv2
    # o_ref   : (tm, Npad)
    z = jnp.dot(xt_ref[...], c_ref[...], preferred_element_type=jnp.float32)
    o_ref[...] = (z + bias_ref[...]).astype(o_ref.dtype)


def _pick_row_tile(m_rows, k_cols, n_cols, out_bytes,
                   budget=12 << 20, cap=512):
    """Row (M = B*Hout) tile: multiple of 16 (bf16 sublane tiling), as large as
    the per-step VMEM budget allows (input + output double-buffered, weight
    operand resident), preferring >=2 grid steps so v7x's two TensorCores both
    get work.  Budget is kept well under the smallest scoped VMEM default."""
    def step_bytes(tm):
        return (2 * tm * k_cols * 2            # xt bf16, double-buffered
                + 2 * tm * n_cols * out_bytes  # out, double-buffered
                + k_cols * n_cols * 2          # C, grid-resident
                + n_cols * 4)                  # bias

    round_up = lambda a, m: -(-a // m) * m
    tm = max(16, min(cap, round_up(m_rows, 16)))
    while tm > 16 and step_bytes(tm) > budget:
        tm -= 16
    if m_rows > 16 and tm >= m_rows:           # avoid a 1-step grid (v7x)
        tm = max(16, (m_rows // 2) // 16 * 16)
    return tm


def spatial_sep_conv_sf(x, w1, w2, bn1, bn2, *, kernel_size, stride, eps=1e-5):
    """Pallas forward of SpatialSepConvSF (BatchNorm in inference mode)."""
    b, cin, h, w = x.shape
    o1 = w1.shape[0]
    o2 = w2.shape[0] // o1
    k, s = kernel_size, stride
    pad = k // 2
    hout = (h + 2 * pad - k) // s + 1
    wout = (w + 2 * pad - k) // s + 1
    ck = cin * k
    c2 = o1 * o2
    n = c2 * wout
    kdim = ck * w

    # ---- fold the BatchNorms into the conv weights (inference mode) --------
    g1, be1, m1, v1 = bn1
    s1 = g1 / jnp.sqrt(v1 + eps)
    b1 = be1 - m1 * s1
    g2, be2, m2, v2 = bn2
    s2f = g2 / jnp.sqrt(v2 + eps)
    s2 = s2f.reshape(o1, o2)
    b2 = (be2 - m2 * s2f).reshape(o1, o2)

    # conv1 weight * BN1 scale, flattened over (Cin, k):  q = c*k + t
    w1s = (w1.reshape(o1, cin, k) * s1[:, None, None]).reshape(o1, ck)
    w1s = w1s.astype(jnp.float32)

    # conv2 grouped weight * BN2 scale: (o1, o2, k)
    w2s = w2.reshape(o1, o2, k) * s2[:, :, None]

    # one-hot tap/stride gather for the (1,k) conv over W (encodes W zero-pad)
    tt = np.arange(k)[:, None, None]
    ww = np.arange(w)[None, :, None]
    vv = np.arange(wout)[None, None, :]
    G = jnp.asarray((ww == vv * s + tt - pad).astype(np.float32))    # (k,W,Wout)

    # per-group conv2 matrices M[g, j, w', wo]
    M = (w2s[:, :, :, None, None] * G[None, None]).sum(axis=2)       # (o1,o2,W,Wout)

    # block-diagonal conv2 operand, columns already in ChannelShuffle(o1) order:
    #   mbd[g, w', (j*o1 + gg)*Wout + wo]  (nonzero only for gg == g)
    eye = jnp.eye(o1, dtype=M.dtype)
    mbd = (M[:, :, :, None, :] * eye[:, None, None, :, None]
           ).transpose(0, 2, 1, 3, 4).reshape(o1, w, n)               # (g, W, N)

    # fuse conv1 into the same matmul:
    #   C[(c*k+t)*W + w', col] = sum_g w1s[g, c*k+t] * mbd[g, w', col]
    cmat = jnp.einsum('gq,gwn->qwn', w1s, mbd).reshape(kdim, n)

    # bias = BN2 shift + BN1 shift propagated through conv2 (boundary aware)
    msum = M.sum(axis=2)                                              # (o1,o2,Wout)
    bias = (b2[:, :, None] + b1[:, None, None] * msum)                # (g, j, wo)
    bias = bias.transpose(1, 0, 2).reshape(1, n)

    # ---- 128-lane-dense output: zero-pad the column (channel*Wout) dim ------
    npad = ((n + 127) // 128) * 128
    cmat = jnp.pad(cmat, ((0, 0), (0, npad - n))).astype(jnp.bfloat16)
    bias = jnp.pad(bias, ((0, 0), (0, npad - n))).astype(jnp.float32)

    # ---- conv1 H-tap gather (folds conv1's H padding + stride), bf16 first --
    xb = x.astype(jnp.bfloat16)
    xp = jnp.pad(xb, ((0, 0), (0, 0), (pad, pad), (0, 0)))
    taps = [xp[:, :, t:t + (hout - 1) * s + 1:s, :] for t in range(k)]
    # (b, cin, k, hout, w) -> rows = b*Hout + h, cols = (c*k + t)*W + w'
    xt = (jnp.stack(taps, axis=2)
          .transpose(0, 3, 1, 2, 4)
          .reshape(b * hout, kdim))

    m_rows = b * hout
    out_bytes = jnp.dtype(x.dtype).itemsize
    tm = _pick_row_tile(m_rows, kdim, npad, out_bytes)
    m_pad = -(-m_rows // tm) * tm
    if m_pad != m_rows:
        xt = jnp.pad(xt, ((0, m_pad - m_rows), (0, 0)))

    out = pl.pallas_call(
        _spatial_sep_kernel,
        out_shape=jax.ShapeDtypeStruct((m_pad, npad), x.dtype),
        grid=(m_pad // tm,),
        in_specs=[
            pl.BlockSpec((tm, kdim), lambda i: (i, 0)),      # xt row tile
            pl.BlockSpec((kdim, npad), lambda i: (0, 0)),    # C (resident)
            pl.BlockSpec((1, npad), lambda i: (0, 0)),       # bias (resident)
        ],
        out_specs=pl.BlockSpec((tm, npad), lambda i: (i, 0)),
        compiler_params=pltpu.CompilerParams(
            dimension_semantics=("parallel",),
            vmem_limit_bytes=48 * 1024 * 1024),
    )(xt, cmat, bias)

    # (rows, Npad) -> NCHW.  Channel order is already the shuffled order.
    out = out[:m_rows, :n].reshape(b, hout, c2, wout).transpose(0, 2, 1, 3)
    return out


def _reference(x, w1, w2, bn1, bn2, *, kernel_size, stride, eps=1e-5):
    """Pure-JAX reference mirroring the PyTorch module (eval-mode BN)."""
    pad = kernel_size // 2
    dn = ("NCHW", "OIHW", "NCHW")
    o1 = w1.shape[0]

    def bn(y, p):
        g, b_, m, v = p
        return ((y - m[None, :, None, None])
                / jnp.sqrt(v[None, :, None, None] + eps)
                * g[None, :, None, None] + b_[None, :, None, None])

    y = jax.lax.conv_general_dilated(x, w1, (stride, 1),
                                     ((pad, pad), (0, 0)),
                                     dimension_numbers=dn,
                                     precision=jax.lax.Precision.HIGHEST)
    y = bn(y, bn1)
    y = jax.lax.conv_general_dilated(y, w2, (1, stride),
                                     ((0, 0), (pad, pad)),
                                     dimension_numbers=dn,
                                     feature_group_count=o1,
                                     precision=jax.lax.Precision.HIGHEST)
    y = bn(y, bn2)
    b, c, hh, ww = y.shape
    o2 = c // o1
    y = y.reshape(b, o1, o2, hh, ww).transpose(0, 2, 1, 3, 4).reshape(b, c, hh, ww)
    return y


if __name__ == "__main__":
    in_channels, outs, kernel_size, stride = 4, (3, 2), 3, 2
    o1, o2 = outs
    B, H, W = 4, 16, 16   # B*Hout = 32 rows -> 2 parallel grid steps

    key = jax.random.PRNGKey(0)
    kx, kw1, kw2, kb1, kb2 = jax.random.split(key, 5)
    x = jax.random.normal(kx, (B, in_channels, H, W), jnp.float32)

    w1 = 0.3 * jax.random.normal(kw1, (o1, in_channels, kernel_size, 1), jnp.float32)
    w2 = 0.3 * jax.random.normal(kw2, (o1 * o2, 1, 1, kernel_size), jnp.float32)

    def bn_params(k_, c):
        k1, k2, k3, k4 = jax.random.split(k_, 4)
        gamma = 1.0 + 0.2 * jax.random.normal(k1, (c,), jnp.float32)
        beta = 0.1 * jax.random.normal(k2, (c,), jnp.float32)
        mean = 0.1 * jax.random.normal(k3, (c,), jnp.float32)
        var = jax.random.uniform(k4, (c,), jnp.float32, minval=0.5, maxval=1.5)
        return gamma, beta, mean, var

    bn1 = bn_params(kb1, o1)
    bn2 = bn_params(kb2, o1 * o2)

    out = spatial_sep_conv_sf(x, w1, w2, bn1, bn2,
                              kernel_size=kernel_size, stride=stride)
    out = jax.block_until_ready(out)

    ref = _reference(x, w1, w2, bn1, bn2, kernel_size=kernel_size, stride=stride)
    assert out.shape == ref.shape, (out.shape, ref.shape)
    np.testing.assert_allclose(np.asarray(out), np.asarray(ref),
                               rtol=2e-2, atol=2e-2)
    print("KERNEL_OK")
</pallas_src>

<mosaic_0001>
module attributes {stable_mosaic.version = 11 : i64} {
  func.func @_spatial_sep_kernel(%arg0: i32, %arg1: memref<16x192xbf16, #tpu.memory_space<vmem>>, %arg2: memref<192x128xbf16, #tpu.memory_space<vmem>>, %arg3: memref<1x128xf32, #tpu.memory_space<vmem>>, %arg4: memref<16x128xf32, #tpu.memory_space<vmem>>) attributes {dimension_semantics = [#tpu.dimension_semantics<parallel>], iteration_bounds = array<i64: 2>, scalar_prefetch = 0 : i64, scratch_operands = 0 : i64, tpu.core_type = #tpu.core_type<tc>, window_params = [{transform_indices = @transform_0, window_bounds = array<i64: 16, 192>}, {pipeline_mode = #tpu.pipeline_mode<synchronous>, transform_indices = @transform_1, window_bounds = array<i64: 192, 128>}, {pipeline_mode = #tpu.pipeline_mode<synchronous>, transform_indices = @transform_2, window_bounds = array<i64: 1, 128>}, {transform_indices = @transform_3, window_bounds = array<i64: 16, 128>}]} {
    %c0 = arith.constant 0 : index
    %c0_0 = arith.constant 0 : index
    %0 = vector.load %arg1[%c0, %c0_0] : memref<16x192xbf16, #tpu.memory_space<vmem>>, vector<16x192xbf16>
    %c0_1 = arith.constant 0 : index
    %c0_2 = arith.constant 0 : index
    %1 = vector.load %arg2[%c0_1, %c0_2] : memref<192x128xbf16, #tpu.memory_space<vmem>>, vector<192x128xbf16>
    %cst = arith.constant dense<0.000000e+00> : vector<16x128xf32>
    %2 = tpu.matmul %0, %1, %cst {dimension_numbers = #tpu.dot_dimension_numbers<[1], [0], [0], [1], [0, 0, 1, 1], [], []>} : vector<16x192xbf16>, vector<192x128xbf16>, vector<16x128xf32> -> vector<16x128xf32>
    %c0_3 = arith.constant 0 : index
    %c0_4 = arith.constant 0 : index
    %3 = vector.load %arg3[%c0_3, %c0_4] : memref<1x128xf32, #tpu.memory_space<vmem>>, vector<1x128xf32>
    %4 = vector.broadcast %3 : vector<1x128xf32> to vector<16x128xf32>
    %5 = arith.addf %2, %4 : vector<16x128xf32>
    %c0_5 = arith.constant 0 : index
    %c0_6 = arith.constant 0 : index
    %6 = vector.load %arg4[%c0_5, %c0_6] : memref<16x128xf32, #tpu.memory_space<vmem>>, vector<16x128xf32>
    tpu.vector_store %arg4[%c0_5, %c0_6], %5 {strides = array<i32>} : memref<16x128xf32, #tpu.memory_space<vmem>>, vector<16x128xf32>,
    return
  }
  func.func @transform_0(%arg0: i32) -> (i32, i32) {
    %c0_i32 = arith.constant 0 : i32
    %c0_i32_0 = arith.constant 0 : i32
    return %arg0, %c0_i32 : i32, i32
  }
  func.func @transform_1(%arg0: i32) -> (i32, i32) {
    %c0_i32 = arith.constant 0 : i32
    %c0_i32_0 = arith.constant 0 : i32
    %c0_i32_1 = arith.constant 0 : i32
    return %c0_i32, %c0_i32_0 : i32, i32
  }
  func.func @transform_2(%arg0: i32) -> (i32, i32) {
    %c0_i32 = arith.constant 0 : i32
    %c0_i32_0 = arith.constant 0 : i32
    %c0_i32_1 = arith.constant 0 : i32
    return %c0_i32, %c0_i32_0 : i32, i32
  }
  func.func @transform_3(%arg0: i32) -> (i32, i32) {
    %c0_i32 = arith.constant 0 : i32
    %c0_i32_0 = arith.constant 0 : i32
    return %arg0, %c0_i32 : i32, i32
  }
}

</mosaic_0001>

<bundles_post_ra>
// kernel: tpu_custom_call.1
= control target key start
LH: loop header
LB: loop body
LE: loop exit
PB: predicated region body
PF: predicated region fallthrough
CT: control target
= control target key end

     0   :  { %8 = vsyncpa [#allocation3], 0  ;;  %s953_s0 = inlined_call_operand.hbm [shape: bf16[32,192], index: 0, kind: input, shape index: {}]   ;;  %s954_s1 = inlined_call_operand.hbm [shape: bf16[192,128], index: 1, kind: input, shape index: {}]   ;;  %s955_s2 = inlined_call_operand.vmem [shape: f32[1,128], index: 2, kind: input, shape index: {}]   ;;  %s956_s3 = inlined_call_operand.hbm [shape: f32[32,128], index: 3, kind: output, shape index: {}]  }
   0x1   :  { %10 = vsyncpa [#allocation3 + $0x1], 0 }
   0x2   :  { %11 = vsyncpa [#allocation6], 0 }
   0x3   :  { %12 = vsyncpa [#allocation4], 0 }
   0x4   :  { %14 = vsyncpa [#allocation4 + $0x1], 0  ;;  %s741_s12 = smov 0   ;;  %s743_s13 = smov 0  }
   0x5   :  { %s745_s14 = smov 0   ;;  %s747_s15 = smov 0  }
   0x6 LB: > { %s762_s16 = sadd.s32 4294967295, %s709_s15   ;;  %s466_s17 = sadd.s32 4294967294, %s709_s15   ;;  %s709_s15 = sphi %s747_s15, %s976_s15   ;;  %s705_s14 = sphi %s745_s14, %s975_s14   ;;  %s701_s13 = sphi %s743_s13, %s974_s13   ;;  %s697_s12 = sphi %s741_s12, %s973_s12  }
   0x7   : > { %p40_p0 = scmp.ne.s32.totalorder %s701_s13, %s697_s12  ;;  %p957_p1 = scmp.eq.s32.totalorder %s762_s16, 0 }
   0x8   : > { %p112_p3 = scmp.eq.s32.totalorder %s466_s17, 1  ;;  %p467_p5 = scmp.ge.s32.totalorder %s709_s15, 1 }
   0x9   : > { %p771_p4 = por %p957_p1, %p40_p0  ;;  %p119_p7 = scmp.lt.s32.totalorder %s709_s15, 3 }
   0xa   : > { %p776_p6 = por %p112_p3, %p40_p0  ;;  %s711_s21 = smov [#allocation5]  }
   0xb   : > { %s960_s18 = scalar_select %p771_p4, 1, 0 }
   0xc   : > { %s961_s19 = scalar_select %p776_p6, 1, 0 }
   0xd   : > { %p781_p8 = pnand %p467_p5, %p119_p7  ;;  %s131_s22 = sshll.u32 %s711_s21, 4  ;;  %s785_s22 = int_to_ptr.vmem [resolvable:$true] %s131_s22 }
   0xe   : > { %s797_s24 = sadd.s32 1, %s709_s15   ;;  %s27_s25 = sadd.s32 1, %s705_s14 }
   0xf   : > { %s962_s20 = scalar_select %p781_p8, 1, 0 }
  0x10   : > { %p510_p9 = pneg %p781_p8  ;;  %s24_s26 = ssub.s32 %s709_s15, %s797_s24 }
  0x11   : > { %s581_s29 = scalar_lea.hbm %s954_s1, 1536 }
  0x12   : > { %p792_p11 = pnand %p510_p9, %p957_p1  ;;  %p582_p12 = scmp.ne.s32.totalorder %s954_s1, %s581_s29 }
  0x13   : > { %p588_p5 = scmp.lt.u32.totalorder %s581_s29, %s954_s1 }
  0x14   : > { %p583_p13 = pneg %p792_p11 }
  0x16   : > { %p584_p0 = pnand %p583_p13, %p582_p12 }
  0x18   : > { %p585_p3 = pneg %p584_p0 }
  0x1a   : > { %p590_p7 = pnand %p588_p5, %p585_p3 }
  0x1c   : > { %593 = shalt.err (!%p590_p7)
}
  0x1d   : > { %s594_s7 = scalar_lea.vmem %s785_s22, 1536  ;;  %p602_p2 = scmp.lt.s32.totalorder %s785_s22, %s785_s22 }
  0x1e   : > { %p595_p9 = scmp.ne.s32.totalorder %s785_s22, %s594_s7  ;;  %p603_p6 = scmp.lt.s32.totalorder %s594_s7, %s594_s7 }
  0x20   : > { %p597_p10 = pnand %p595_p9, %p583_p13  ;;  %p604_p4 = por %p603_p6, %p602_p2 }
  0x22   : > { %p598_p1 = pneg %p597_p10 }
  0x24   : > { %p605_p8 = pnand %p604_p4, %p598_p1 }
  0x26   : > { %608 = shalt.err (!%p605_p8)
}
  0x27   : > { %s712_s8 = smov 64   ;;  %s713_s9 = smov 4  }
  0x28   : > { %513 = dma.hbm_to_vmem [thread:$0]  (!%p792_p11), %s954_s1, 1536, %s785_s22, [#allocation6], %s712_s8, %s712_s8, %s713_s9  }
  0x29   : > { %p25_p2 = scmp.eq.s32.totalorder %s24_s26, 0  ;;  %p34_p1 = scmp.ne.s32.totalorder %s705_s14, %s701_s13 }
  0x2a   : > { %p35_p4 = scmp.eq.s32.totalorder %s709_s15, 0  ;;  %p523_p6 = scmp.lt.s32.totalorder %s709_s15, 2 }
  0x2b   : > { %s828_s17 = scalar_select %p25_p2, %s705_s14, %s27_s25  }
  0x2c   : > { %p36_p8 = por %p35_p4, %p34_p1  ;;  %p964_p10 = scmp.eq.s32.totalorder %s762_s16, 1 }
  0x2d   : > { %s148_s27 = sand.u32 1, %s705_s14   ;;  %s500_s28 = sshll.u32 %s709_s15, 8 }
  0x2e   : > { %p832_p12 = por %p964_p10, %p34_p1  ;;  %s470_s29 = sshll.u32 %s148_s27, 4 }
  0x2f   : > { %s841_s4 = scalar_lea.hbm %s953_s0, %s500_s28  ;;  %s152_s22 = scalar_lea.vmem [#allocation2], %s470_s29 }
  0x30   : > { %s160_s25 = sshll.u32 %s152_s22, 4  ;;  %p843_p11 = pnand %p523_p6, %p36_p8  ;;  %s847_s25 = int_to_ptr.vmem [resolvable:$true] %s160_s25 }
  0x31   : > { %s849_s5 = scalar_lea.sflag [#allocation3], %s148_s27  ;;  %s609_s6 = scalar_lea.hbm %s841_s4, 256 }
  0x32   : > { %p610_p13 = scmp.ne.s32.totalorder %s841_s4, %s609_s6  ;;  %p611_p0 = pneg %p843_p11 }
  0x33   : > { %s614_s9 = scalar_lea.hbm %s953_s0, 512  ;;  %p615_p7 = scmp.lt.u32.totalorder %s841_s4, %s953_s0 }
  0x34   : > { %p612_p3 = pnand %p611_p0, %p610_p13  ;;  %p616_p9 = scmp.lt.u32.totalorder %s614_s9, %s609_s6 }
  0x35   : > { %p618_p1 = scmp.lt.u32.totalorder %s609_s6, %s841_s4 }
  0x36   : > { %p613_p5 = pneg %p612_p3  ;;  %p617_p2 = por %p616_p9, %p615_p7 }
  0x38   : > { %p619_p4 = por %p618_p1, %p617_p2 }
  0x3a   : > { %p620_p6 = pnand %p619_p4, %p613_p5 }
  0x3c   : > { %623 = shalt.err (!%p620_p6)
}
  0x3d   : > { %s624_s27 = scalar_lea.vmem %s847_s25, 256  ;;  %s714_s28 = smov [#allocation2]  }
  0x3e   : > { %p625_p8 = scmp.ne.s32.totalorder %s847_s25, %s624_s27  ;;  %s629_s29 = sshll.u32 %s714_s28, 4  ;;  %s630_s29 = int_to_ptr.vmem [resolvable:$false] %s629_s29 }
  0x3f   : > { %s631_s23 = scalar_lea.vmem %s630_s29, 512  ;;  %p632_p3 = scmp.lt.s32.totalorder %s847_s25, %s630_s29 }
  0x40   : > { %p627_p10 = pnand %p625_p8, %p611_p0  ;;  %p633_p7 = scmp.lt.s32.totalorder %s631_s23, %s624_s27 }
  0x42   : > { %p628_p13 = pneg %p627_p10  ;;  %p634_p9 = por %p633_p7, %p632_p3 }
  0x44   : > { %p635_p2 = pnand %p634_p9, %p628_p13 }
  0x46   : > { %638 = shalt.err (!%p635_p2)
}
  0x47   : > { %s715_s30 = smov 128   ;;  %s716_s22 = smov 8  }
  0x48   : > { %517 = dma.hbm_to_vmem [thread:$0]  (!%p843_p11), %s841_s4, 256, %s847_s25, %s849_s5, %s715_s30, %s715_s30, %s716_s22  }
  0x49   : > { %p967_p0 = scmp.ne.s32.totalorder %s962_s20, 0 }
  0x4a   : > { %s880_s6 = sand.u32 (!%p967_p0), 1, %s701_s13   ;;  %p968_p5 = scmp.ne.s32.totalorder (!%p967_p0), %s960_s18, 0 }
  0x4b   : > { %172 = sbr.rel (%p967_p0) target bundleno = 366 (0x16e), region = 32  ;;  %s475_s7 = sshll.u32 (!%p967_p0), %s880_s6, 4 }
  0x4c   : > { %s175_s8 = scalar_lea.sflag (!%p967_p0), [#allocation3], %s880_s6  ;;  %s886_s9 = scalar_lea.vmem (!%p967_p0), [#allocation2], %s475_s7 }
  0x52   : > { %684 = dma.done.wait (%p968_p5), %s175_s8, 256  }
  0x53   : > { %686 = vsyncadd (%p968_p5), %s175_s8, 4294967040  ;;  %p969_p11 = scmp.eq.s32.totalorder %s762_s16, 0 }
  0x55   : > { %688 = dma.done.wait (%p969_p11), [#allocation6], 1536   ;;  %p970_p1 = pmov %p969_p11 }
  0x56   : > { %v717_v0 = vmov 0   ;;  %v566_v1 = vld [vmem:[#allocation5] sm:$0xff]   ;;  %v567_v2 = vld [vmem:[#allocation5 + $0x8] sm:$0xff]   ;;  %v568_v3 = vld [vmem:[#allocation5 + $0x10] sm:$0xff]   ;;  %vm322_vm0 = vcmask 523264   ;;  %s204_s4 = scalar_lea.vmem [#allocation7], %s475_s7 }
  0x57   : > { %690 = vsyncadd (%p970_p1), [#allocation6], 4294965760  ;;  %326 = vmatprep.subr.bf16.mxu0 %v717_v0  ;;  %v569_v4 = vld [vmem:[#allocation5 + $0x18] sm:$0xff]   ;;  %v570_v6 = vld [vmem:[#allocation5 + $0x20] sm:$0xff]   ;;  %s383_s25 = sshll.u32 %s204_s4, 4  ;;  %s501_s26 = sshll.u32 %s762_s16, 8  ;;  %s904_s25 = int_to_ptr.vmem [resolvable:$true] %s383_s25 }
  0x58   : > { %327 = vmatpush1.bf16.msra.mxu0 %v566_v1  ;;  %v580_v5 = vld [vmem:[%s886_s9 + $0x4] ss:$8 sps:$4 sm:$0xff]   ;;  %v578_v14 = vld [vmem:[%s886_s9] ss:$8 sps:$4 sm:$0xff]   ;;  %s909_s11 = scalar_lea.hbm %s956_s3, %s501_s26  ;;  %s370_s27 = scalar_lea.sflag [#allocation4], %s880_s6 }
  0x59   : > { %328 = vmatprep.subr.bf16.mxu0 %v717_v0  ;;  %493 = vmatprep.mubr.msk.bf16.mxu0 %vm322_vm0, %v580_v5  ;;  %v571_v7 = vld [vmem:[#allocation5 + $0x28] sm:$0xff]   ;;  %v572_v8 = vld [vmem:[#allocation5 + $0x30] sm:$0xff]   ;;  %v573_v9 = vld [vmem:[#allocation5 + $0x38] sm:$0xff]   ;;  %s639_s16 = scalar_lea.vmem %s904_s25, 256  ;;  %s718_s28 = smov [#allocation7]  }
  0x5a   : > { %v574_v10 = vld [vmem:[#allocation5 + $0x40] sm:$0xff]   ;;  %v575_v11 = vld [vmem:[#allocation5 + $0x48] sm:$0xff]   ;;  %v576_v12 = vld [vmem:[#allocation5 + $0x50] sm:$0xff]   ;;  %p640_p4 = scmp.ne.s32.totalorder %s904_s25, %s639_s16  ;;  %s643_s29 = sshll.u32 %s718_s28, 4  ;;  %s644_s29 = int_to_ptr.vmem [resolvable:$false] %s643_s29 }
  0x5b   : > { %v577_v13 = vld [vmem:[#allocation5 + $0x58] sm:$0xff]   ;;  %v478_v15 = vld [vmem:[%s955_s2] ss:$0 sm:$0xff]  ;;  %s645_s23 = scalar_lea.vmem %s644_s29, 512  ;;  %p646_p10 = scmp.lt.s32.totalorder %s904_s25, %s644_s29 }
  0x5c   : > { %329 = vmatpush1.bf16.msra.mxu0 %v567_v2  ;;  %p641_p6 = pnand %p640_p4, %p832_p12  ;;  %p647_p13 = scmp.lt.s32.totalorder %s645_s23, %s639_s16 }
  0x5d   : > { %330 = vmatprep.subr.bf16.mxu0 %v717_v0 }
  0x5e   : > { %p642_p8 = pneg %p641_p6  ;;  %p648_p3 = por %p647_p13, %p646_p10 }
  0x60   : > { %331 = vmatpush1.bf16.msra.mxu0 %v568_v3  ;;  %p649_p7 = pnand %p648_p3, %p642_p8 }
  0x61   : > { %332 = vmatprep.subr.bf16.mxu0 %v717_v0 }
  0x64   : > { %333 = vmatpush1.bf16.msra.mxu0 %v569_v4 }
  0x65   : > { %334 = vmatprep.subr.bf16.mxu0 %v717_v0 }
  0x68   : > { %335 = vmatpush1.bf16.msra.mxu0 %v570_v6 }
  0x69   : > { %336 = vmatprep.subr.bf16.mxu0 %v717_v0 }
  0x6c   : > { %337 = vmatpush1.bf16.msra.mxu0 %v571_v7 }
  0x6d   : > { %338 = vmatprep.subr.bf16.mxu0 %v717_v0 }
  0x70   : > { %339 = vmatpush1.bf16.msra.mxu0 %v572_v8 }
  0x71   : > { %340 = vmatprep.subr.bf16.mxu0 %v717_v0 }
  0x74   : > { %341 = vmatpush1.bf16.msra.mxu0 %v573_v9 }
  0x75   : > { %342 = vmatprep.subr.bf16.mxu0 %v717_v0 }
  0x78   : > { %343 = vmatpush1.bf16.msra.mxu0 %v574_v10 }
  0x79   : > { %344 = vmatprep.subr.bf16.mxu0 %v717_v0 }
  0x7c   : > { %345 = vmatpush1.bf16.msra.mxu0 %v575_v11 }
  0x7d   : > { %346 = vmatprep.subr.bf16.mxu0 %v717_v0 }
  0x80   : > { %347 = vmatpush1.bf16.msra.mxu0 %v576_v12 }
  0x81   : > { %348 = vmatprep.subr.bf16.mxu0 %v717_v0 }
  0x84   : > { %349 = vmatpush1.bf16.msra.mxu0 %v577_v13 }
  0x87   : > { %359 = vmatmul.mubr.bf16.vlgmr.msra.gmra.mrb[0].mxu0 %v578_v14 }
 0x15a   : > { %v360_v16 = vpop.f32.mrb[0].mxu0 }
 0x15b   : > { %v361_v17 = vadd.f32 %v478_v15, %v360_v16  ;;  %v362_v18 = vpop.f32.mrb[1].mxu0 }
 0x15c   : > { %v363_v19 = vpop.f32.mrb[2].mxu0 }
 0x15d   : > { %367 = vst [vmem:[%s204_s4] sm:$0xff] %v361_v17  ;;  %v364_v20 = vadd.f32 %v478_v15, %v363_v19  ;;  %v365_v21 = vpop.f32.mrb[3].mxu0 }
 0x15f   : > { %368 = vst [vmem:[%s204_s4 + $0x8] sm:$0xff] %v364_v20 }
 0x160   : > { %652 = shalt.err (!%p649_p7)
}
 0x161   : > { %s653_s30 = scalar_lea.hbm %s909_s11, 256  ;;  %s657_s8 = scalar_lea.hbm %s956_s3, 512 }
 0x162   : > { %p654_p9 = scmp.ne.s32.totalorder %s909_s11, %s653_s30  ;;  %p658_p5 = scmp.lt.u32.totalorder %s909_s11, %s956_s3 }
 0x163   : > { %p659_p11 = scmp.lt.u32.totalorder %s657_s8, %s653_s30  ;;  %p661_p4 = scmp.lt.u32.totalorder %s653_s30, %s909_s11 }
 0x164   : > { %p655_p2 = pnand %p654_p9, %p832_p12 }
 0x165   : > { %p660_p1 = por %p659_p11, %p658_p5 }
 0x166   : > { %p656_p0 = pneg %p655_p2 }
 0x167   : > { %p662_p6 = por %p661_p4, %p660_p1 }
 0x169   : > { %p663_p8 = pnand %p662_p6, %p656_p0 }
 0x16b   : > { %666 = shalt.err (!%p663_p8)
}
 0x16c   : > { %s719_s20 = smov 128   ;;  %s720_s4 = smov 8  }
 0x16d   : > { %508 = dma.vmem_to_hbm [thread:$0]  (%p832_p12), %s904_s25, 256, %s909_s11, %s370_s27, %s719_s20, %s719_s20, %s720_s4  }
 0x16e PF: > { %s398_s26 = sand.u32 1, %s697_s12   ;;  %p971_p10 = scmp.ne.s32.totalorder %s961_s19, 0 }
 0x16f   : > { %p972_p13 = scmp.ge.s32.totalorder %s709_s15, 2  ;;  %s399_s5 = scalar_lea.sflag [#allocation4], %s398_s26 }
 0x171   : > { %p519_p3 = pnand %p972_p13, %p971_p10 }
 0x173   : > { %692 = dma.done.wait (!%p519_p3), %s399_s5, 256  }
 0x174   : > { %694 = vsyncadd (!%p519_p3), %s399_s5, 4294967040  ;;  %p17_p7 = scmp.ge.s32.totalorder %s797_s24, 4   ;;  %s973_s12 = smov %s701_s13 }
 0x175   : > { %s974_s13 = smov %s705_s14  ;;  %s975_s14 = smov %s828_s17 }
 0x176   : > { %s976_s15 = smov %s797_s24  ;;  %19 = sbr.rel (!%p17_p7) target bundleno = 6 (0x6), region = 81 }
 0x17d   :  { %404 = vsyncpa [#allocation3], 1 }
 0x17e   :  { %406 = vsyncpa [#allocation3 + $0x1], 1 }
 0x17f   :  { %407 = vsyncpa [#allocation6], 1 }
 0x180   :  { %408 = vsyncpa [#allocation4], 1 }
 0x181   :  { %410 = vsyncpa [#allocation4 + $0x1], 1 }

</bundles_post_ra>
